<compile_context>
chip_gen: v6e
topology: v6e:2x2x1
jax: 0.10.0
libtpu: 0.0.40
codegen_flags: <defaults>
</compile_context>

<pallas_src>
import numpy as np
import jax
import jax.numpy as jnp
from jax.experimental import pallas as pl
from jax.experimental.pallas import tpu as pltpu

# ---- synthetic hyper-parameters (module __init__ fields) ----
T_OBS = 8        # hyper_params.obs_len
T_PRED = 12      # hyper_params.pred_len
K = 6            # hyper_params.k
S = 4            # hyper_params.num_samples
DIM = 2          # hyper_params.traj_dim
HIDDEN = 32      # synthetic baseline hidden width
STATIC_DIST = 0.3
N_PED = 16

TT = T_OBS + T_PRED          # 20
ST = S * T_PRED              # 48
OUT_W = 128                  # padded (lane-dense) reconstruction output width (>= 2*ST)


def eigentrajectory_kernel(traj_ref, projx_ref, projy_ref, recon_b_ref, anc_ref,
                           w1_ref, aux1_ref, w2_ref, b2_ref, csum_ref, dred_ref,
                           recon_ref, loss_ref):
    f32 = jnp.float32
    traj = traj_ref[...]                         # (N, 2*TT) = [obs_x | pred_x | obs_y | pred_y]
    n = traj.shape[0]
    x_all = traj[:, :TT]
    y_all = traj[:, TT:]
    pred_x = x_all[:, T_OBS:]                    # (N, T_PRED) ground-truth prediction
    pred_y = y_all[:, T_OBS:]

    # ---- TrajNorm parameters (per pedestrian) ----
    ox = x_all[:, T_OBS - 1:T_OBS]               # origin = last observed position, (N,1)
    oy = y_all[:, T_OBS - 1:T_OBS]
    dx = ox - x_all[:, T_OBS - 3:T_OBS - 2]
    dy = oy - y_all[:, T_OBS - 3:T_OBS - 2]
    r2 = dx * dx + dy * dy

    # moving/static mask without sqrt: ||d/2|| > static  <=>  r2 > (2*static)^2
    mask = r2 > (2.0 * STATIC_DIST) ** 2         # (N,1) bool
    # single widest broadcast, reused (sliced) by every branch select below
    mask_w = jnp.broadcast_to(mask, (n, 2 * ST))

    inv_r = jax.lax.rsqrt(jnp.maximum(r2, 1e-24))
    degen = r2 <= 1e-24                          # threshold matches the clamp (no inf branch)
    cos_t = jnp.where(degen, 1.0, dx * inv_r)    # atan2(0,0)-style identity rotation
    sin_t = jnp.where(degen, 0.0, dy * inv_r)
    sca = jnp.where(degen, 1.0, 2.0 * inv_r)     # moving-branch scale, applied to coefficients
    inv_sca = jnp.where(degen, 1.0, 0.5 * r2 * inv_r)   # = r/2

    # ---- shared (unscaled) normalization: center + rotate both halves at once ----
    xc = x_all - ox
    yc = y_all - oy
    xn = xc * cos_t + yc * sin_t                 # (N, TT)
    yn = yc * cos_t - xc * sin_t

    # ---- fused ETDescriptor projections; columns = [pred_m | obs_m | pred_s | obs_s] ----
    C_all = (jnp.dot(xn, projx_ref[...], preferred_element_type=f32)
             + jnp.dot(yn, projy_ref[...], preferred_element_type=f32))        # (N, 4K)
    C_sel = jnp.where(mask_w[:, :2 * K], C_all[:, :2 * K] * sca, C_all[:, 2 * K:])  # (N, 2K)
    C_pred_gt = C_sel[:, :K]                     # (N, K) branch-selected gt coefficients

    # ---- obs_ori, centered over all pedestrians ----
    orix = ox - jnp.mean(ox, axis=0, keepdims=True)
    oriy = oy - jnp.mean(oy, axis=0, keepdims=True)

    # TODO(synk): baseline_model / hook_func are external modules; modeled as a deterministic
    # 2-layer MLP bridge: (C_obs, obs_ori) -> refined coefficients (N, S*K).
    aux = aux1_ref[...]                          # (3, H) = [w1o_x ; w1o_y ; b1]
    h = jnp.dot(C_sel, w1_ref[...], preferred_element_type=f32)  # W1 pred-rows are zero
    h = jnp.maximum(h + orix * aux[0:1, :] + oriy * aux[1:2, :] + aux[2:3, :], 0.0)
    refine = jnp.dot(h, w2_ref[...], preferred_element_type=f32) + b2_ref[...]   # (N, S*K)

    # ---- ETAnchor: add branch-selected anchors (sample-major flattened) ----
    anc = anc_ref[...]                           # (2, S*K): row 0 moving, row 1 static
    C_pred = refine + jnp.where(mask_w[:, :S * K], anc[0:1, :], anc[1:2, :])      # (N, S*K)

    # ---- fused reconstruction: one matmul over all S samples & both branches ----
    rec = jnp.dot(C_pred, recon_b_ref[...], preferred_element_type=f32)   # (N, 4*ST)
    xy_n = jnp.where(mask_w, rec[:, :2 * ST] * inv_sca, rec[:, 2 * ST:])  # (N, 2*ST) = [x | y]
    rx_n = xy_n[:, :ST]
    ry_n = xy_n[:, ST:]
    # single shared denormalization (rotate back + origin) AFTER the branch select
    rx = rx_n * cos_t - ry_n * sin_t + ox
    ry = rx_n * sin_t + ry_n * cos_t + oy

    # lane-dense 128-wide output slab (unmasked stores); wrapper slices back to 2*ST
    recon_ref[...] = jnp.concatenate(
        [rx, ry, jnp.zeros((n, OUT_W - 2 * ST), f32)], axis=1)

    # ---- losses: per-sample segment reductions on the (idle) MXU, then min over samples ----
    dcoef = C_pred - jnp.tile(C_pred_gt, (1, S))                          # (N, S*K)
    coef_err = jnp.sqrt(jnp.dot(dcoef * dcoef, csum_ref[...],
                                preferred_element_type=f32))              # (N, S)
    ex = rx - jnp.tile(pred_x, (1, S))
    ey = ry - jnp.tile(pred_y, (1, S))
    disp = jnp.sqrt(ex * ex + ey * ey)                                    # (N, S*T_PRED)
    ade_fde = jnp.dot(disp, dred_ref[...], preferred_element_type=f32)    # (N, 2S) = [ade | fde]

    min_coef = jnp.min(coef_err, axis=1, keepdims=True)                   # (N,1)
    min_ade = jnp.min(ade_fde[:, :S], axis=1, keepdims=True)
    min_fde = jnp.min(ade_fde[:, S:], axis=1, keepdims=True)
    loss3 = jnp.mean(jnp.concatenate([min_coef, min_ade, min_fde], axis=1),
                     axis=0, keepdims=True)                               # (1,3)
    loss_ref[...] = jnp.concatenate([loss3, jnp.zeros((1, 5), f32)], axis=1)


def pack_params(params):
    """One-time, host-side (numpy) packing of the fixed weights into lane-dense / block-diag
    operands for the kernel.  Called once outside the jitted per-call path."""
    f32 = np.float32
    p = {k: np.asarray(v, f32) for k, v in params.items()}

    def split_xy(u):                             # torch-style interleaved (T*2, K) eigenbasis
        return u[0::2, :], u[1::2, :]

    uom_x, uom_y = split_xy(p["U_obs_m"])
    uos_x, uos_y = split_xy(p["U_obs_s"])
    upm_x, upm_y = split_xy(p["U_pred_m"])
    ups_x, ups_y = split_xy(p["U_pred_s"])

    # projection bases; rows = [obs times | pred times], cols = [pred_m | obs_m | pred_s | obs_s]
    def make_proj(uo_m, up_m, uo_s, up_s):
        P = np.zeros((TT, 4 * K), f32)
        P[T_OBS:, 0 * K:1 * K] = up_m
        P[:T_OBS, 1 * K:2 * K] = uo_m
        P[T_OBS:, 2 * K:3 * K] = up_s
        P[:T_OBS, 3 * K:4 * K] = uo_s
        return P
    proj_x = make_proj(uom_x, upm_x, uos_x, ups_x)
    proj_y = make_proj(uom_y, upm_y, uos_y, ups_y)

    # block-diagonal reconstruction basis: (S*K, 4*S*T_PRED), cols = [rx_m | ry_m | rx_s | ry_s]
    eye_s = np.eye(S, dtype=f32)
    recon = np.zeros((S, K, 4, S, T_PRED), f32)
    for bi, blk in enumerate([upm_x, upm_y, ups_x, ups_y]):      # blk: (T_PRED, K)
        recon[:, :, bi, :, :] = eye_s[:, None, :, None] * blk.T[None, :, None, :]
    recon_basis = recon.reshape(S * K, 4 * ST)

    # anchors flattened sample-major: (2, S*K)
    anchors = np.stack([p["anchor_m"].T.reshape(-1), p["anchor_s"].T.reshape(-1)], axis=0)

    # baseline-bridge MLP: W1 zero-padded over the pred-coefficient columns of C_sel
    w1 = np.concatenate([np.zeros((K, HIDDEN), f32), p["W1c"]], axis=0)   # (2K, H)
    aux1 = np.concatenate([p["W1o"], p["b1"]], axis=0)                    # (3, H)
    w2, b2 = p["W2"], p["b2"]

    # segment-reduction matrices for the loss (MXU is idle, so reductions go through it)
    coef_sum = np.kron(eye_s, np.ones((K, 1), f32))                       # (S*K, S)
    ade_mat = np.kron(eye_s, np.full((T_PRED, 1), 1.0 / T_PRED, f32))     # (S*T, S)
    fde_mat = np.kron(eye_s, np.eye(T_PRED, dtype=f32)[:, -1:])           # (S*T, S)
    disp_red = np.concatenate([ade_mat, fde_mat], axis=1)                 # (S*T, 2S)

    keys = dict(proj_x=proj_x, proj_y=proj_y, recon_basis=recon_basis, anchors=anchors,
                w1=w1, aux1=aux1, w2=w2, b2=b2, coef_sum=coef_sum, disp_red=disp_red)
    return {k: jnp.asarray(v) for k, v in keys.items()}


def eigentrajectory_forward(obs_traj, pred_traj, packed):
    """obs_traj: (N, T_obs, 2), pred_traj: (N, T_pred, 2), packed: pack_params(...) output."""
    f32 = jnp.float32
    n_ped = obs_traj.shape[0]
    # slab order [obs_x | pred_x | obs_y | pred_y] -> contiguous x/y halves inside the kernel
    traj_slab = jnp.concatenate(
        [obs_traj[..., 0], pred_traj[..., 0], obs_traj[..., 1], pred_traj[..., 1]],
        axis=1).astype(f32)                                               # (N, 2*TT)

    inputs = [traj_slab, packed["proj_x"], packed["proj_y"], packed["recon_basis"],
              packed["anchors"], packed["w1"], packed["aux1"], packed["w2"], packed["b2"],
              packed["coef_sum"], packed["disp_red"]]

    vmem = pl.BlockSpec(memory_space=pltpu.MemorySpace.VMEM)
    out_shapes = (
        jax.ShapeDtypeStruct((n_ped, OUT_W), f32),   # padded [rx | ry | 0] lane-dense slab
        jax.ShapeDtypeStruct((1, 8), f32),           # [eig, ade, fde, 0...]
    )
    # Tiny kernel: advertise the real cost so XLA doesn't over-serialize neighbors around it.
    cost = pl.CostEstimate(flops=260_000, transcendentals=2_000, bytes_accessed=60_000)

    rec_slab, loss_row = pl.pallas_call(
        eigentrajectory_kernel,
        out_shape=out_shapes,
        in_specs=[vmem] * len(inputs),
        out_specs=(vmem, vmem),
        cost_estimate=cost,
    )(*inputs)

    rx = rec_slab[:, :ST].reshape(n_ped, S, T_PRED).transpose(1, 0, 2)    # (S, N, T_pred)
    ry = rec_slab[:, ST:2 * ST].reshape(n_ped, S, T_PRED).transpose(1, 0, 2)
    recon_traj = jnp.stack([rx, ry], axis=-1)                             # (S, N, T_pred, 2)
    return {
        "recon_traj": recon_traj,
        "loss_eigentraj": loss_row[0, 0],
        "loss_euclidean_ade": loss_row[0, 1],
        "loss_euclidean_fde": loss_row[0, 2],
    }


if __name__ == "__main__":
    key = jax.random.PRNGKey(0)
    ks = jax.random.split(key, 13)

    # deterministic trajectories: random walks; second half of peds near-static
    start = jax.random.normal(ks[0], (N_PED, 1, 2)) * 5.0
    steps_obs = jax.random.normal(ks[1], (N_PED, T_OBS, 2)) * 0.5
    steps_pred = jax.random.normal(ks[2], (N_PED, T_PRED, 2)) * 0.5
    scale = jnp.concatenate(
        [jnp.ones((N_PED // 2, 1, 1)), jnp.full((N_PED - N_PED // 2, 1, 1), 0.02)], axis=0)
    obs_traj = start + jnp.cumsum(steps_obs * scale, axis=1)
    pred_traj = obs_traj[:, -1:, :] + jnp.cumsum(steps_pred * scale, axis=1)

    # deterministic synthetic parameters (shapes per ETDescriptor / ETAnchor __init__)
    params = {
        "U_obs_m": jax.random.normal(ks[3], (T_OBS * DIM, K)) * 0.3,
        "U_obs_s": jax.random.normal(ks[4], (T_OBS * DIM, K)) * 0.3,
        "U_pred_m": jax.random.normal(ks[5], (T_PRED * DIM, K)) * 0.3,
        "U_pred_s": jax.random.normal(ks[6], (T_PRED * DIM, K)) * 0.3,
        "anchor_m": jax.random.normal(ks[7], (K, S)) * 0.1,
        "anchor_s": jax.random.normal(ks[8], (K, S)) * 0.1,
        "W1c": jax.random.normal(ks[9], (K, HIDDEN)) * 0.2,
        "W1o": jax.random.normal(ks[10], (2, HIDDEN)) * 0.2,
        "b1": jnp.zeros((1, HIDDEN), jnp.float32),
        "W2": jax.random.normal(ks[11], (HIDDEN, K * S)) * 0.2,
        "b2": jnp.zeros((1, K * S), jnp.float32),
    }

    packed = pack_params(params)          # one-time host-side packing (outside jit)
    fwd = jax.jit(eigentrajectory_forward)
    out = fwd(obs_traj.astype(jnp.float32), pred_traj.astype(jnp.float32), packed)
    jax.block_until_ready(out)

    assert out["recon_traj"].shape == (S, N_PED, T_PRED, DIM)
    assert out["loss_eigentraj"].shape == ()
    assert out["loss_euclidean_ade"].shape == ()
    assert out["loss_euclidean_fde"].shape == ()
    assert bool(jnp.all(jnp.isfinite(out["recon_traj"])))
    assert bool(jnp.isfinite(out["loss_eigentraj"]))
    assert bool(jnp.isfinite(out["loss_euclidean_ade"]))
    assert bool(jnp.isfinite(out["loss_euclidean_fde"]))
    print("KERNEL_OK")
</pallas_src>

<mosaic_0001>
module attributes {stable_mosaic.version = 11 : i64} {
  func.func @eigentrajectory_kernel(%arg0: memref<16x40xf32, #tpu.memory_space<vmem>>, %arg1: memref<20x24xf32, #tpu.memory_space<vmem>>, %arg2: memref<20x24xf32, #tpu.memory_space<vmem>>, %arg3: memref<24x192xf32, #tpu.memory_space<vmem>>, %arg4: memref<2x24xf32, #tpu.memory_space<vmem>>, %arg5: memref<12x32xf32, #tpu.memory_space<vmem>>, %arg6: memref<3x32xf32, #tpu.memory_space<vmem>>, %arg7: memref<32x24xf32, #tpu.memory_space<vmem>>, %arg8: memref<1x24xf32, #tpu.memory_space<vmem>>, %arg9: memref<24x4xf32, #tpu.memory_space<vmem>>, %arg10: memref<48x8xf32, #tpu.memory_space<vmem>>, %arg11: memref<16x128xf32, #tpu.memory_space<vmem>>, %arg12: memref<1x8xf32, #tpu.memory_space<vmem>>) attributes {dimension_semantics = [], scalar_prefetch = 0 : i64, scratch_operands = 0 : i64, tpu.core_type = #tpu.core_type<tc>} {
    %c0 = arith.constant 0 : index
    %c0_0 = arith.constant 0 : index
    %0 = vector.load %arg0[%c0, %c0_0] : memref<16x40xf32, #tpu.memory_space<vmem>>, vector<16x40xf32>
    %1 = vector.extract_strided_slice %0 {offsets = [0, 0], sizes = [16, 20], strides = [1, 1]} : vector<16x40xf32> to vector<16x20xf32>
    %2 = vector.extract_strided_slice %0 {offsets = [0, 20], sizes = [16, 20], strides = [1, 1]} : vector<16x40xf32> to vector<16x20xf32>
    %3 = vector.extract_strided_slice %1 {offsets = [0, 8], sizes = [16, 12], strides = [1, 1]} : vector<16x20xf32> to vector<16x12xf32>
    %4 = vector.extract_strided_slice %2 {offsets = [0, 8], sizes = [16, 12], strides = [1, 1]} : vector<16x20xf32> to vector<16x12xf32>
    %5 = vector.extract_strided_slice %1 {offsets = [0, 7], sizes = [16, 1], strides = [1, 1]} : vector<16x20xf32> to vector<16x1xf32>
    %6 = vector.extract_strided_slice %2 {offsets = [0, 7], sizes = [16, 1], strides = [1, 1]} : vector<16x20xf32> to vector<16x1xf32>
    %7 = vector.extract_strided_slice %1 {offsets = [0, 5], sizes = [16, 1], strides = [1, 1]} : vector<16x20xf32> to vector<16x1xf32>
    %8 = arith.subf %5, %7 : vector<16x1xf32>
    %9 = vector.extract_strided_slice %2 {offsets = [0, 5], sizes = [16, 1], strides = [1, 1]} : vector<16x20xf32> to vector<16x1xf32>
    %10 = arith.subf %6, %9 : vector<16x1xf32>
    %11 = arith.mulf %8, %8 : vector<16x1xf32>
    %12 = arith.mulf %10, %10 : vector<16x1xf32>
    %13 = arith.addf %11, %12 : vector<16x1xf32>
    %cst = arith.constant 3.600000e-01 : f32
    %14 = vector.broadcast %cst : f32 to vector<16x1xf32>
    %15 = arith.cmpf ogt, %13, %14 : vector<16x1xf32>
    %16 = vector.shape_cast %15 : vector<16x1xi1> to vector<16x1xi1>
    %17 = vector.broadcast %16 : vector<16x1xi1> to vector<16x96xi1>
    %cst_1 = arith.constant 1.000000e-24 : f32
    %18 = vector.broadcast %cst_1 : f32 to vector<16x1xf32>
    %19 = arith.maximumf %13, %18 : vector<16x1xf32>
    %20 = math.rsqrt %19 : vector<16x1xf32>
    %cst_2 = arith.constant 1.000000e-24 : f32
    %21 = vector.broadcast %cst_2 : f32 to vector<16x1xf32>
    %22 = arith.cmpf ole, %13, %21 : vector<16x1xf32>
    %23 = arith.mulf %8, %20 : vector<16x1xf32>
    %cst_3 = arith.constant 1.000000e+00 : f32
    %24 = vector.broadcast %cst_3 : f32 to vector<16x1xf32>
    %25 = arith.select %22, %24, %23 : vector<16x1xi1>, vector<16x1xf32>
    %26 = arith.mulf %10, %20 : vector<16x1xf32>
    %cst_4 = arith.constant 0.000000e+00 : f32
    %27 = vector.broadcast %cst_4 : f32 to vector<16x1xf32>
    %28 = arith.select %22, %27, %26 : vector<16x1xi1>, vector<16x1xf32>
    %cst_5 = arith.constant 2.000000e+00 : f32
    %29 = vector.broadcast %cst_5 : f32 to vector<16x1xf32>
    %30 = arith.mulf %29, %20 : vector<16x1xf32>
    %cst_6 = arith.constant 1.000000e+00 : f32
    %31 = vector.broadcast %cst_6 : f32 to vector<16x1xf32>
    %32 = arith.select %22, %31, %30 : vector<16x1xi1>, vector<16x1xf32>
    %cst_7 = arith.constant 5.000000e-01 : f32
    %33 = vector.broadcast %cst_7 : f32 to vector<16x1xf32>
    %34 = arith.mulf %33, %13 : vector<16x1xf32>
    %35 = arith.mulf %34, %20 : vector<16x1xf32>
    %cst_8 = arith.constant 1.000000e+00 : f32
    %36 = vector.broadcast %cst_8 : f32 to vector<16x1xf32>
    %37 = arith.select %22, %36, %35 : vector<16x1xi1>, vector<16x1xf32>
    %38 = vector.broadcast %5 : vector<16x1xf32> to vector<16x20xf32>
    %39 = arith.subf %1, %38 : vector<16x20xf32>
    %40 = vector.broadcast %6 : vector<16x1xf32> to vector<16x20xf32>
    %41 = arith.subf %2, %40 : vector<16x20xf32>
    %42 = vector.broadcast %25 : vector<16x1xf32> to vector<16x20xf32>
    %43 = arith.mulf %39, %42 : vector<16x20xf32>
    %44 = vector.broadcast %28 : vector<16x1xf32> to vector<16x20xf32>
    %45 = arith.mulf %41, %44 : vector<16x20xf32>
    %46 = arith.addf %43, %45 : vector<16x20xf32>
    %47 = vector.broadcast %25 : vector<16x1xf32> to vector<16x20xf32>
    %48 = arith.mulf %41, %47 : vector<16x20xf32>
    %49 = vector.broadcast %28 : vector<16x1xf32> to vector<16x20xf32>
    %50 = arith.mulf %39, %49 : vector<16x20xf32>
    %51 = arith.subf %48, %50 : vector<16x20xf32>
    %c0_9 = arith.constant 0 : index
    %c0_10 = arith.constant 0 : index
    %52 = vector.load %arg1[%c0_9, %c0_10] : memref<20x24xf32, #tpu.memory_space<vmem>>, vector<20x24xf32>
    %cst_11 = arith.constant dense<0.000000e+00> : vector<16x24xf32>
    %53 = tpu.matmul %46, %52, %cst_11 {dimension_numbers = #tpu.dot_dimension_numbers<[1], [0], [0], [1], [0, 0, 1, 1], [], []>} : vector<16x20xf32>, vector<20x24xf32>, vector<16x24xf32> -> vector<16x24xf32>
    %c0_12 = arith.constant 0 : index
    %c0_13 = arith.constant 0 : index
    %54 = vector.load %arg2[%c0_12, %c0_13] : memref<20x24xf32, #tpu.memory_space<vmem>>, vector<20x24xf32>
    %cst_14 = arith.constant dense<0.000000e+00> : vector<16x24xf32>
    %55 = tpu.matmul %51, %54, %cst_14 {dimension_numbers = #tpu.dot_dimension_numbers<[1], [0], [0], [1], [0, 0, 1, 1], [], []>} : vector<16x20xf32>, vector<20x24xf32>, vector<16x24xf32> -> vector<16x24xf32>
    %56 = arith.addf %53, %55 : vector<16x24xf32>
    %57 = vector.extract_strided_slice %17 {offsets = [0, 0], sizes = [16, 12], strides = [1, 1]} : vector<16x96xi1> to vector<16x12xi1>
    %58 = vector.extract_strided_slice %56 {offsets = [0, 0], sizes = [16, 12], strides = [1, 1]} : vector<16x24xf32> to vector<16x12xf32>
    %59 = vector.broadcast %32 : vector<16x1xf32> to vector<16x12xf32>
    %60 = arith.mulf %58, %59 : vector<16x12xf32>
    %61 = vector.extract_strided_slice %56 {offsets = [0, 12], sizes = [16, 12], strides = [1, 1]} : vector<16x24xf32> to vector<16x12xf32>
    %62 = arith.select %57, %60, %61 : vector<16x12xi1>, vector<16x12xf32>
    %63 = vector.extract_strided_slice %62 {offsets = [0, 0], sizes = [16, 6], strides = [1, 1]} : vector<16x12xf32> to vector<16x6xf32>
    %cst_15 = arith.constant dense<0.000000e+00> : vector<1xf32>
    %64 = vector.multi_reduction <add>, %5, %cst_15 [0] : vector<16x1xf32> to vector<1xf32>
    %65 = vector.shape_cast %64 : vector<1xf32> to vector<1x1xf32>
    %cst_16 = arith.constant 1.600000e+01 : f32
    %66 = vector.broadcast %cst_16 : f32 to vector<1x1xf32>
    %67 = arith.divf %65, %66 : vector<1x1xf32>
    %68 = vector.broadcast %67 : vector<1x1xf32> to vector<16x1xf32>
    %69 = arith.subf %5, %68 : vector<16x1xf32>
    %cst_17 = arith.constant dense<0.000000e+00> : vector<1xf32>
    %70 = vector.multi_reduction <add>, %6, %cst_17 [0] : vector<16x1xf32> to vector<1xf32>
    %71 = vector.shape_cast %70 : vector<1xf32> to vector<1x1xf32>
    %cst_18 = arith.constant 1.600000e+01 : f32
    %72 = vector.broadcast %cst_18 : f32 to vector<1x1xf32>
    %73 = arith.divf %71, %72 : vector<1x1xf32>
    %74 = vector.broadcast %73 : vector<1x1xf32> to vector<16x1xf32>
    %75 = arith.subf %6, %74 : vector<16x1xf32>
    %c0_19 = arith.constant 0 : index
    %c0_20 = arith.constant 0 : index
    %76 = vector.load %arg6[%c0_19, %c0_20] : memref<3x32xf32, #tpu.memory_space<vmem>>, vector<3x32xf32>
    %c0_21 = arith.constant 0 : index
    %c0_22 = arith.constant 0 : index
    %77 = vector.load %arg5[%c0_21, %c0_22] : memref<12x32xf32, #tpu.memory_space<vmem>>, vector<12x32xf32>
    %cst_23 = arith.constant dense<0.000000e+00> : vector<16x32xf32>
    %78 = tpu.matmul %62, %77, %cst_23 {dimension_numbers = #tpu.dot_dimension_numbers<[1], [0], [0], [1], [0, 0, 1, 1], [], []>} : vector<16x12xf32>, vector<12x32xf32>, vector<16x32xf32> -> vector<16x32xf32>
    %79 = vector.extract_strided_slice %76 {offsets = [0, 0], sizes = [1, 32], strides = [1, 1]} : vector<3x32xf32> to vector<1x32xf32>
    %80 = vector.broadcast %69 : vector<16x1xf32> to vector<16x32xf32>
    %81 = vector.broadcast %79 : vector<1x32xf32> to vector<16x32xf32>
    %82 = arith.mulf %80, %81 : vector<16x32xf32>
    %83 = arith.addf %78, %82 : vector<16x32xf32>
    %84 = vector.extract_strided_slice %76 {offsets = [1, 0], sizes = [1, 32], strides = [1, 1]} : vector<3x32xf32> to vector<1x32xf32>
    %85 = vector.broadcast %75 : vector<16x1xf32> to vector<16x32xf32>
    %86 = vector.broadcast %84 : vector<1x32xf32> to vector<16x32xf32>
    %87 = arith.mulf %85, %86 : vector<16x32xf32>
    %88 = arith.addf %83, %87 : vector<16x32xf32>
    %89 = vector.extract_strided_slice %76 {offsets = [2, 0], sizes = [1, 32], strides = [1, 1]} : vector<3x32xf32> to vector<1x32xf32>
    %90 = vector.broadcast %89 : vector<1x32xf32> to vector<16x32xf32>
    %91 = arith.addf %88, %90 : vector<16x32xf32>
    %cst_24 = arith.constant 0.000000e+00 : f32
    %92 = vector.broadcast %cst_24 : f32 to vector<16x32xf32>
    %93 = arith.maximumf %91, %92 : vector<16x32xf32>
    %c0_25 = arith.constant 0 : index
    %c0_26 = arith.constant 0 : index
    %94 = vector.load %arg7[%c0_25, %c0_26] : memref<32x24xf32, #tpu.memory_space<vmem>>, vector<32x24xf32>
    %cst_27 = arith.constant dense<0.000000e+00> : vector<16x24xf32>
    %95 = tpu.matmul %93, %94, %cst_27 {dimension_numbers = #tpu.dot_dimension_numbers<[1], [0], [0], [1], [0, 0, 1, 1], [], []>} : vector<16x32xf32>, vector<32x24xf32>, vector<16x24xf32> -> vector<16x24xf32>
    %c0_28 = arith.constant 0 : index
    %c0_29 = arith.constant 0 : index
    %96 = vector.load %arg8[%c0_28, %c0_29] : memref<1x24xf32, #tpu.memory_space<vmem>>, vector<1x24xf32>
    %97 = vector.broadcast %96 : vector<1x24xf32> to vector<16x24xf32>
    %98 = arith.addf %95, %97 : vector<16x24xf32>
    %c0_30 = arith.constant 0 : index
    %c0_31 = arith.constant 0 : index
    %99 = vector.load %arg4[%c0_30, %c0_31] : memref<2x24xf32, #tpu.memory_space<vmem>>, vector<2x24xf32>
    %100 = vector.extract_strided_slice %17 {offsets = [0, 0], sizes = [16, 24], strides = [1, 1]} : vector<16x96xi1> to vector<16x24xi1>
    %101 = vector.extract_strided_slice %99 {offsets = [0, 0], sizes = [1, 24], strides = [1, 1]} : vector<2x24xf32> to vector<1x24xf32>
    %102 = vector.extract_strided_slice %99 {offsets = [1, 0], sizes = [1, 24], strides = [1, 1]} : vector<2x24xf32> to vector<1x24xf32>
    %103 = vector.shape_cast %101 : vector<1x24xf32> to vector<1x24xf32>
    %104 = vector.broadcast %103 : vector<1x24xf32> to vector<16x24xf32>
    %105 = vector.shape_cast %102 : vector<1x24xf32> to vector<1x24xf32>
    %106 = vector.broadcast %105 : vector<1x24xf32> to vector<16x24xf32>
    %107 = arith.select %100, %104, %106 : vector<16x24xi1>, vector<16x24xf32>
    %108 = arith.addf %98, %107 : vector<16x24xf32>
    %c0_32 = arith.constant 0 : index
    %c0_33 = arith.constant 0 : index
    %109 = vector.load %arg3[%c0_32, %c0_33] : memref<24x192xf32, #tpu.memory_space<vmem>>, vector<24x192xf32>
    %cst_34 = arith.constant dense<0.000000e+00> : vector<16x192xf32>
    %110 = tpu.matmul %108, %109, %cst_34 {dimension_numbers = #tpu.dot_dimension_numbers<[1], [0], [0], [1], [0, 0, 1, 1], [], []>} : vector<16x24xf32>, vector<24x192xf32>, vector<16x192xf32> -> vector<16x192xf32>
    %111 = vector.extract_strided_slice %110 {offsets = [0, 0], sizes = [16, 96], strides = [1, 1]} : vector<16x192xf32> to vector<16x96xf32>
    %112 = vector.broadcast %37 : vector<16x1xf32> to vector<16x96xf32>
    %113 = arith.mulf %111, %112 : vector<16x96xf32>
    %114 = vector.extract_strided_slice %110 {offsets = [0, 96], sizes = [16, 96], strides = [1, 1]} : vector<16x192xf32> to vector<16x96xf32>
    %115 = arith.select %17, %113, %114 : vector<16x96xi1>, vector<16x96xf32>
    %116 = vector.extract_strided_slice %115 {offsets = [0, 0], sizes = [16, 48], strides = [1, 1]} : vector<16x96xf32> to vector<16x48xf32>
    %117 = vector.extract_strided_slice %115 {offsets = [0, 48], sizes = [16, 48], strides = [1, 1]} : vector<16x96xf32> to vector<16x48xf32>
    %118 = vector.broadcast %25 : vector<16x1xf32> to vector<16x48xf32>
    %119 = arith.mulf %116, %118 : vector<16x48xf32>
    %120 = vector.broadcast %28 : vector<16x1xf32> to vector<16x48xf32>
    %121 = arith.mulf %117, %120 : vector<16x48xf32>
    %122 = arith.subf %119, %121 : vector<16x48xf32>
    %123 = vector.broadcast %5 : vector<16x1xf32> to vector<16x48xf32>
    %124 = arith.addf %122, %123 : vector<16x48xf32>
    %125 = vector.broadcast %28 : vector<16x1xf32> to vector<16x48xf32>
    %126 = arith.mulf %116, %125 : vector<16x48xf32>
    %127 = vector.broadcast %25 : vector<16x1xf32> to vector<16x48xf32>
    %128 = arith.mulf %117, %127 : vector<16x48xf32>
    %129 = arith.addf %126, %128 : vector<16x48xf32>
    %130 = vector.broadcast %6 : vector<16x1xf32> to vector<16x48xf32>
    %131 = arith.addf %129, %130 : vector<16x48xf32>
    %cst_35 = arith.constant 0.000000e+00 : f32
    %132 = vector.broadcast %cst_35 : f32 to vector<16x32xf32>
    %133 = tpu.concatenate %124, %131, %132 in 1 : vector<16x48xf32>, vector<16x48xf32>, vector<16x32xf32> -> vector<16x128xf32>
    %c0_36 = arith.constant 0 : index
    %c0_37 = arith.constant 0 : index
    %134 = vector.load %arg11[%c0_36, %c0_37] : memref<16x128xf32, #tpu.memory_space<vmem>>, vector<16x128xf32>
    tpu.vector_store %arg11[%c0_36, %c0_37], %133 {strides = array<i32>} : memref<16x128xf32, #tpu.memory_space<vmem>>, vector<16x128xf32>,
    %135 = tpu.concatenate %63, %63, %63, %63 in 1 : vector<16x6xf32>, vector<16x6xf32>, vector<16x6xf32>, vector<16x6xf32> -> vector<16x24xf32>
    %136 = arith.subf %108, %135 : vector<16x24xf32>
    %137 = arith.mulf %136, %136 : vector<16x24xf32>
    %c0_38 = arith.constant 0 : index
    %c0_39 = arith.constant 0 : index
    %138 = vector.load %arg9[%c0_38, %c0_39] : memref<24x4xf32, #tpu.memory_space<vmem>>, vector<24x4xf32>
    %cst_40 = arith.constant dense<0.000000e+00> : vector<16x4xf32>
    %139 = tpu.matmul %137, %138, %cst_40 {dimension_numbers = #tpu.dot_dimension_numbers<[1], [0], [0], [1], [0, 0, 1, 1], [], []>} : vector<16x24xf32>, vector<24x4xf32>, vector<16x4xf32> -> vector<16x4xf32>
    %140 = math.sqrt %139 : vector<16x4xf32>
    %141 = tpu.concatenate %3, %3, %3, %3 in 1 : vector<16x12xf32>, vector<16x12xf32>, vector<16x12xf32>, vector<16x12xf32> -> vector<16x48xf32>
    %142 = arith.subf %124, %141 : vector<16x48xf32>
    %143 = tpu.concatenate %4, %4, %4, %4 in 1 : vector<16x12xf32>, vector<16x12xf32>, vector<16x12xf32>, vector<16x12xf32> -> vector<16x48xf32>
    %144 = arith.subf %131, %143 : vector<16x48xf32>
    %145 = arith.mulf %142, %142 : vector<16x48xf32>
    %146 = arith.mulf %144, %144 : vector<16x48xf32>
    %147 = arith.addf %145, %146 : vector<16x48xf32>
    %148 = math.sqrt %147 : vector<16x48xf32>
    %c0_41 = arith.constant 0 : index
    %c0_42 = arith.constant 0 : index
    %149 = vector.load %arg10[%c0_41, %c0_42] : memref<48x8xf32, #tpu.memory_space<vmem>>, vector<48x8xf32>
    %cst_43 = arith.constant dense<0.000000e+00> : vector<16x8xf32>
    %150 = tpu.matmul %148, %149, %cst_43 {dimension_numbers = #tpu.dot_dimension_numbers<[1], [0], [0], [1], [0, 0, 1, 1], [], []>} : vector<16x48xf32>, vector<48x8xf32>, vector<16x8xf32> -> vector<16x8xf32>
    %cst_44 = arith.constant dense<0x7F800000> : vector<16xf32>
    %151 = vector.multi_reduction <minimumf>, %140, %cst_44 [1] : vector<16x4xf32> to vector<16xf32>
    %152 = vector.shape_cast %151 : vector<16xf32> to vector<16x1xf32>
    %153 = vector.extract_strided_slice %150 {offsets = [0, 0], sizes = [16, 4], strides = [1, 1]} : vector<16x8xf32> to vector<16x4xf32>
    %cst_45 = arith.constant dense<0x7F800000> : vector<16xf32>
    %154 = vector.multi_reduction <minimumf>, %153, %cst_45 [1] : vector<16x4xf32> to vector<16xf32>
    %155 = vector.shape_cast %154 : vector<16xf32> to vector<16x1xf32>
    %156 = vector.extract_strided_slice %150 {offsets = [0, 4], sizes = [16, 4], strides = [1, 1]} : vector<16x8xf32> to vector<16x4xf32>
    %cst_46 = arith.constant dense<0x7F800000> : vector<16xf32>
    %157 = vector.multi_reduction <minimumf>, %156, %cst_46 [1] : vector<16x4xf32> to vector<16xf32>
    %158 = vector.shape_cast %157 : vector<16xf32> to vector<16x1xf32>
    %159 = tpu.concatenate %152, %155, %158 in 1 : vector<16x1xf32>, vector<16x1xf32>, vector<16x1xf32> -> vector<16x3xf32>
    %cst_47 = arith.constant dense<0.000000e+00> : vector<3xf32>
    %160 = vector.multi_reduction <add>, %159, %cst_47 [0] : vector<16x3xf32> to vector<3xf32>
    %161 = vector.shape_cast %160 : vector<3xf32> to vector<1x3xf32>
    %cst_48 = arith.constant 1.600000e+01 : f32
    %162 = vector.broadcast %cst_48 : f32 to vector<1x3xf32>
    %163 = arith.divf %161, %162 : vector<1x3xf32>
    %cst_49 = arith.constant 0.000000e+00 : f32
    %164 = vector.broadcast %cst_49 : f32 to vector<1x5xf32>
    %165 = tpu.concatenate %163, %164 in 1 : vector<1x3xf32>, vector<1x5xf32> -> vector<1x8xf32>
    %c0_50 = arith.constant 0 : index
    %c0_51 = arith.constant 0 : index
    %166 = vector.load %arg12[%c0_50, %c0_51] : memref<1x8xf32, #tpu.memory_space<vmem>>, vector<1x8xf32>
    tpu.vector_store %arg12[%c0_50, %c0_51], %165 {strides = array<i32>} : memref<1x8xf32, #tpu.memory_space<vmem>>, vector<1x8xf32>,
    return
  }
}

</mosaic_0001>

<bundles_post_ra>
// kernel: eigentrajectory_forward.1
= control target key start
LH: loop header
LB: loop body
LE: loop exit
PB: predicated region body
PF: predicated region fallthrough
CT: control target
= control target key end

     0   :  { %s1316_s23 = smov 2   ;;  %s1317_s26 = smov 108   ;;  %v1318_v14 = vmov 7   ;;  %v1320_v29 = vmov 27   ;;  %vm201_vm2 = vcmask 1043456   ;;  %vm196_vm3 = vcmask 162816   ;;  %s1777_s0 = inlined_call_operand.vmem [shape: f32[16,40], index: 0, kind: input, shape index: {}]   ;;  %s1778_s1 = inlined_call_operand.vmem [shape: f32[20,24], index: 1, kind: input, shape index: {}]   ;;  %s1779_s2 = inlined_call_operand.vmem [shape: f32[20,24], index: 2, kind: input, shape index: {}]   ;;  %s1780_s5 = inlined_call_operand.vmem [shape: f32[12,32], index: 5, kind: input, shape index: {}]   ;;  %s1781_s7 = inlined_call_operand.vmem [shape: f32[32,24], index: 7, kind: input, shape index: {}]   ;;  %s1782_s6 = inlined_call_operand.vmem [shape: f32[3,32], index: 6, kind: input, shape index: {}]   ;;  %s1783_s3 = inlined_call_operand.vmem [shape: f32[24,192], index: 3, kind: input, shape index: {}]   ;;  %s1784_s4 = inlined_call_operand.vmem [shape: f32[2,24], index: 4, kind: input, shape index: {}]   ;;  %s1785_s8 = inlined_call_operand.vmem [shape: f32[1,24], index: 8, kind: input, shape index: {}]   ;;  %s1786_s9 = inlined_call_operand.vmem [shape: f32[24,4], index: 9, kind: input, shape index: {}]   ;;  %s1787_s10 = inlined_call_operand.vmem [shape: f32[48,8], index: 10, kind: input, shape index: {}]   ;;  %s1788_s11 = inlined_call_operand.vmem [shape: f32[16,128], index: 11, kind: output, shape index: {0}]   ;;  %s1789_s12 = inlined_call_operand.vmem [shape: f32[1,8], index: 12, kind: output, shape index: {1}]  }
   0x1   :  { %v1406_v0 = vld [vmem:[%s1777_s0] sm:$0xff]  ;;  %v1412_v1 = vld [vmem:[%s1777_s0 + $0x8] sm:$0xff]  ;;  %1295 = vset.pattern.permute.xlu1 %v1318_v14  ;;  %1294 = vset.pattern.permute.xlu0 %v1318_v14  ;;  %s1319_s0 = smov 20   ;;  %v186_v36 = vld [vmem:[%s1778_s1 + $0x10] sm:$0xf]  ;;  %vm386_vm6 = vcmask 64568  }
   0x2   :  { %44 = vrot.lane.b32.xlu0 %v1406_v0, %s1316_s23  ;;  %1221 = vmatprep.subr.msk.mxu1 %vm201_vm2, %v186_v36  ;;  %v185_v38 = vld [vmem:[%s1778_s1 + $0x8] sm:$0xff]  ;;  %v184_v40 = vld [vmem:[%s1778_s1] sm:$0xff]  ;;  %v189_v46 = vld [vmem:[%s1779_s2 + $0x10] sm:$0xf]  ;;  %vm400_vm7 = vcmask 228568   ;;  %vm432_vm8 = vcmask 97280  }
   0x3   :  { %1222 = vmatpush3.msk.msra.mxu1 %vm201_vm2, %v186_v36  ;;  %1212 = vmatprep.subr.msk.mxu0 %vm201_vm2, %v189_v46  ;;  %v188_v52 = vld [vmem:[%s1779_s2 + $0x8] sm:$0xff]  ;;  %v187_v53 = vld [vmem:[%s1779_s2] sm:$0xff]  ;;  %vm554_vm11 = vcmask 261120   ;;  %vm655_vm12 = vcmask 195584   ;;  %s1327_s25 = smov 100   ;;  %s1330_s27 = smov 124  }
   0x4   :  { %1223 = vmatprep.subr.mxu1 %v185_v38  ;;  %1213 = vmatpush3.msk.msra.mxu0 %vm201_vm2, %v189_v46  ;;  %s1331_s28 = smov 6   ;;  %s1332_s29 = smov 28   ;;  %vm969_vm13 = vcmask 293888   ;;  %vm831_vm14 = vcmask 48128   ;;  %vm836_vm15 = vcmask 146432  }
   0x5   :  { %1224 = vmatpush3.msra.mxu1 %v185_v38  ;;  %1214 = vmatprep.subr.mxu0 %v188_v52  ;;  %s1333_s30 = smov 8   ;;  %s1334_s13 = smov 12  }
   0x6   :  { %46 = vrot.lane.b32.xlu0 %v1412_v1, %s1316_s23  ;;  %1225 = vmatprep.subr.mxu1 %v184_v40  ;;  %s1322_s23 = smov 116   ;;  %s1335_s14 = smov 80  }
   0x7   :  { %1226 = vmatpush3.msra.mxu1 %v184_v40  ;;  %1215 = vmatpush3.msra.mxu0 %v188_v52  ;;  %s1336_s21 = smov 18  }
   0x8   :  { %1216 = vmatprep.subr.mxu0 %v187_v53 }
   0x9   :  { %1217 = vmatpush3.msra.mxu0 %v187_v53 }
  0x74   :  { %v45_v2 = vpop.permute.xlu0 %44 }
  0x75   :  { %v50_v3 = vsub.f32 %v1406_v0, %v45_v2 }
  0x77   :  { %v52_v4 = vmul.f32 %v50_v3, %v50_v3 }
  0x78   :  { %v47_v5 = vpop.permute.xlu0 %46 }
  0x79   :  { %v51_v6 = vsub.f32 %v1412_v1, %v47_v5  ;;  %56 = vrot.lane.b32.xlu1 %v52_v4, %s1317_s26  ;;  %v1321_v5 = vmov 0  }
  0x7b   :  { %v53_v7 = vmul.f32 %v51_v6, %v51_v6 }
  0x7d   :  { %58 = vrot.lane.b32.xlu1 %v53_v7, %s1317_s26 }
  0xeb   :  { %v57_v8 = vpop.permute.xlu1 %56 }
  0xec   :  { %v1419_v9 = vadd.f32 %v57_v8, %v52_v4 }
  0xee   :  { %v76_v10 = vmax.f32 %v1419_v9, 1e-24  ;;  %v110_v15 = vmul.f32 0.5, %v1419_v9  ;;  %vm80_vm0 = vcmp.le.f32.partialorder %v1419_v9, 1e-24 }
  0xef   :  { %v59_v11 = vpop.permute.xlu1 %58  ;;  %vm64_vm4 = vcmp.gt.f32.partialorder %v1419_v9, 0.36 }
  0xf0   :  { %1304 = vrsqrt.f32 %v76_v10  ;;  %v1422_v12 = vadd.f32 %v59_v11, %v53_v7 }
  0xf2   :  { %v77_v13 = vmax.f32 %v1422_v12, 1e-24  ;;  %v111_v18 = vmul.f32 0.5, %v1422_v12  ;;  %vm81_vm1 = vcmp.le.f32.partialorder %v1422_v12, 1e-24 }
  0xf3   :  { %vm65_vm5 = vcmp.gt.f32.partialorder %v1422_v12, 0.36 }
  0xf4   :  { %1306 = vrsqrt.f32 %v77_v13  ;;  %v67_v8 = vsel %vm65_vm5, 1, %v1321_v5 }
  0xfd   :  { %v1428_v16 = vpop.eup %1304 }
  0xfe   :  { %88 = vrot.lane.b32.xlu0 %v1428_v16, %s1319_s0  ;;  %v1433_v17 = vmul.f32 %v1428_v16, %v110_v15  ;;  %v82_v30 = vmul.f32 %v1428_v16, %v50_v3  ;;  %v106_v59 = vmul.f32 2.0, %v1428_v16 }
 0x100   :  { %v84_v31 = vsel %vm80_vm0, 1.0, %v82_v30  ;;  %v108_v63 = vsel %vm80_vm0, 1.0, %v106_v59 }
 0x101   :  { %v1436_v19 = vpop.eup %1306 }
 0x102   :  { %90 = vrot.lane.b32.xlu1 %v1436_v19, %s1319_s0  ;;  %v1441_v20 = vmul.f32 %v1436_v19, %v111_v18  ;;  %v83_v32 = vmul.f32 %v1436_v19, %v51_v6  ;;  %v107_v10 = vmul.f32 2.0, %v1436_v19  ;;  %v415_v19 = vld [vmem:[%s1780_s5 + $0x8] sm:$0xf] }
 0x103   :  { %1230 = vmatprep.subr.msk.mxu1 %vm201_vm2, %v415_v19 }
 0x104   :  { %v85_v33 = vsel %vm81_vm1, 1.0, %v83_v32  ;;  %v109_v15 = vsel %vm81_vm1, 1.0, %v107_v10  ;;  %v426_v10 = vlaneseq }
 0x170   :  { %v89_v21 = vpop.permute.xlu0 %88 }
 0x171   :  { %v94_v22 = vmul.f32 %v89_v21, %v50_v3  ;;  %v387_v21 = vsel %vm386_vm6, %v1406_v0, 0.0 }
 0x173   :  { %98 = vrot.lane.b32.xlu0 %v94_v22, %s1317_s26  ;;  %v388_v22 = vsel %vm386_vm6, %v1412_v1, 0.0 }
 0x174   :  { %v91_v23 = vpop.permute.xlu1 %90 }
 0x175   :  { %v95_v24 = vmul.f32 %v91_v23, %v51_v6  ;;  %v66_v6 = vsel %vm64_vm4, 1, %v1321_v5  ;;  %v389_v23 = vadd.f32 %v388_v22, %v387_v21 }
 0x177   :  { %100 = vrot.lane.b32.xlu1 %v95_v24, %s1317_s26  ;;  %117 = vperm.xlu0 %1294, %v1406_v0   ;;  %v390_v24 = vrot.slane %v389_v23, 4 }
 0x17b   :  { %121 = vperm.xlu1 %1295, %v1412_v1  }
 0x1e5   :  { %v99_v25 = vpop.permute.xlu0 %98 }
 0x1e6   :  { %v104_v26 = vsel %vm80_vm0, 0.0, %v99_v25  ;;  %v401_v25 = vsel %vm400_vm7, %v1406_v0, 0.0 }
 0x1e7   :  { %150 = vperm.xlu1 %1295, %v104_v26   ;;  %v402_v26 = vsel %vm400_vm7, %v1412_v1, 0.0  ;;  %vm1113_vm7 = vcmask 31744  }
 0x1e9   :  { %v101_v27 = vpop.permute.xlu1 %100 }
 0x1ea   :  { %v105_v28 = vsel %vm81_vm1, 0.0, %v101_v27  ;;  %v403_v27 = vadd.f32 %v402_v26, %v401_v25 }
 0x1eb   :  { %155 = vperm.xlu0 %1294, %v105_v28   ;;  %1296 = vset.pattern.permute.xlu1 %v1320_v29  ;;  %v391_v28 = vadd.f32 %v390_v24, %v389_v23 }
 0x1ec   :  { %127 = vperm.xlu1 %1296, %v1406_v0   ;;  %v404_v30 = vrot.slane %v403_v27, 4 }
 0x1ee   :  { %v405_v32 = vadd.f32 %v404_v30, %v403_v27 }
 0x1ef   :  { %1297 = vset.pattern.permute.xlu0 %v1320_v29 }
 0x1f0   :  { %131 = vperm.xlu0 %1297, %v1412_v1   ;;  %1298 = vset.pattern.permute.xlu1 %v1318_v14  ;;  %v406_v36 = vrot.slane %v405_v32, 2 }
 0x1f1   :  { %138 = vperm.xlu1 %1298, %v84_v31   ;;  %v392_v31 = vrot.slane %v391_v28, 2 }
 0x1f2   :  { %v1467_v35 = vpop.permute.xlu0 %117  ;;  %v407_v40 = vadd.f32 %v406_v36, %v405_v32 }
 0x1f3   :  { %v124_v37 = vsub.f32 %v1406_v0, %v1467_v35 }
 0x1f4   :  { %1299 = vset.pattern.permute.xlu0 %v1318_v14 }
 0x1f5   :  { %143 = vperm.xlu1 %1298, %v85_v33   ;;  %v393_v33 = vadd.f32 %v392_v31, %v391_v28 }
 0x1f6   :  { %v1465_v34 = vpop.permute.xlu1 %121 }
 0x1f7   :  { %v125_v42 = vsub.f32 %v1412_v1, %v1465_v34  ;;  %v394_v38 = vrot.slane %v393_v33, 1 }
 0x262   :  { %v1479_v39 = vpop.permute.xlu1 %150 }
 0x263   :  { %v172_v41 = vmul.f32 %v1479_v39, %v124_v37 }
 0x265   :  { %176 = vrot.lane.b32.xlu0 %v172_v41, %s1319_s0  ;;  %v395_v41 = vadd.f32 %v394_v38, %v393_v33 }
 0x266   :  { %v1488_v43 = vpop.permute.xlu0 %155 }
 0x267   :  { %v173_v44 = vmul.f32 %v1488_v43, %v125_v42  ;;  %v1491_v45 = vpop.permute.xlu1 %127  ;;  %v397_v46 = vmul.f32 0.0625, %v395_v41 }
 0x268   :  { %v134_v47 = vsub.f32 %v1406_v0, %v1491_v45 }
 0x269   :  { %178 = vrot.lane.b32.xlu1 %v173_v44, %s1319_s0  ;;  %v408_v44 = vrot.slane %v407_v40, 1  ;;  %s1329_s0 = smov 16  }
 0x26a   :  { %v158_v48 = vmul.f32 %v1479_v39, %v134_v47 }
 0x26b   :  { %v1502_v49 = vpop.permute.xlu0 %131  ;;  %v409_v52 = vadd.f32 %v408_v44, %v407_v40 }
 0x26c   :  { %v135_v50 = vsub.f32 %v1412_v1, %v1502_v49  ;;  %162 = vrot.lane.b32.xlu0 %v158_v48, %s1317_s26  ;;  %v1515_v54 = vpop.permute.xlu1 %138 }
 0x26d   :  { %v170_v55 = vmul.f32 %v1515_v54, %v134_v47  ;;  %v146_v2 = vmul.f32 %v1515_v54, %v124_v37  ;;  %v414_v37 = vld [vmem:[%s1780_s5] sm:$0xff] }
 0x26e   :  { %v159_v51 = vmul.f32 %v1488_v43, %v135_v50 }
 0x270   :  { %164 = vrot.lane.b32.xlu1 %v159_v51, %s1317_s26  ;;  %v1518_v56 = vpop.permute.xlu1 %143 }
 0x271   :  { %v171_v60 = vmul.f32 %v1518_v56, %v135_v50  ;;  %v147_v7 = vmul.f32 %v1518_v56, %v125_v42 }
 0x2d7   :  { %v177_v57 = vpop.permute.xlu0 %176 }
 0x2d8   :  { %v182_v58 = vsub.f32 %v170_v55, %v177_v57  ;;  %v399_v55 = vsub.f32 %v1412_v1, %v397_v46  ;;  %v398_v57 = vsub.f32 %v1406_v0, %v397_v46 }
 0x2da   :  { %192 = vrot.lane.b32.xlu0 %v182_v58, %s1317_s26  ;;  %v410_v58 = vmul.f32 0.0625, %v409_v52  ;;  %v650_v52 = vld [vmem:[%s1783_s3 + $0x8] sm:$0xff] }
 0x2db   :  { %v179_v61 = vpop.permute.xlu1 %178 }
 0x2dc   :  { %v183_v62 = vsub.f32 %v171_v60, %v179_v61  ;;  %v411_v59 = vsub.f32 %v1406_v0, %v410_v58  ;;  %v114_v60 = vsel %vm80_vm0, 1.0, %v1433_v17  ;;  %v412_v61 = vsub.f32 %v1412_v1, %v410_v58 }
 0x2dd   :  { %vm805_vm0 = vcmask 392192  }
 0x2de   :  { %194 = vrot.lane.b32.xlu1 %v183_v62, %s1317_s26  ;;  %366 = vperm.xlu0 %1299, %v108_v63   ;;  %v163_v3 = vpop.permute.xlu0 %162  ;;  %v115_v62 = vsel %vm81_vm1, 1.0, %v1441_v20  ;;  %v546_v20 = vld [vmem:[%s1781_s7 + $0x18] sm:$0xff]  ;;  %s1328_s26 = smov 112  }
 0x2df   :  { %v168_v4 = vadd.f32 %v163_v3, %v146_v2 }
 0x2e1   :  { %1227 = vmatprep.mubr.msk.f32.mxu1 %vm196_vm3, %v168_v4 }
 0x2e2   :  { %69 = vperm.xlu1 %1298, %v66_v6   ;;  %v165_v11 = vpop.permute.xlu1 %164  ;;  %72 = vperm.xlu0 %1299, %v67_v8   ;;  %v545_v6 = vld [vmem:[%s1781_s7 + $0x10] sm:$0xff]  ;;  %v543_v8 = vld [vmem:[%s1781_s7] sm:$0xff] }
 0x2e3   :  { %v169_v13 = vadd.f32 %v165_v11, %v147_v7  ;;  %v544_v7 = vld [vmem:[%s1781_s7 + $0x8] sm:$0xff]  ;;  %v427_v11 = vshrl.u32 %v426_v10, 7 }
 0x2e5   :  { %1228 = vmatmul.mubr.msk.f32.vlgmr.msra.gmra.mxu1 %vm196_vm3, %v169_v13  ;;  %v413_v13 = vld [vmem:[%s1782_s6] sm:$0x7]  ;;  %v537_v24 = vsub.s32 2, %v427_v11 }
 0x2e6   :  { %371 = vperm.xlu1 %1298, %v109_v15   ;;  %1231 = vmatpush3.msk.msra.mxu1 %vm201_vm2, %v415_v19 }
 0x2e7   :  { %1232 = vmatprep.subr.mxu1 %v414_v37  ;;  %v538_v33 = vrot.slane %v413_v13, %v537_v24 }
 0x2e8   :  { %1233 = vmatpush3.msra.mxu1 %v414_v37 }
 0x2e9   :  { %1237 = vmatprep.subr.mxu1 %v546_v20 }
 0x34c   :  { %v193_v16 = vpop.permute.xlu0 %192 }
 0x34d   :  { %1218 = vmatprep.mubr.msk.f32.mxu0 %vm196_vm3, %v193_v16  ;;  %v428_v16 = vsub.s32 0, %v427_v11 }
 0x34f   :  { %v429_v19 = vrot.slane %v413_v13, %v428_v16 }
 0x350   :  { %v195_v18 = vpop.permute.xlu1 %194 }
 0x351   :  { %1219 = vmatmul.mubr.msk.f32.vlgmr.msra.gmra.mxu0 %vm196_vm3, %v195_v18  ;;  %v529_v18 = vsub.s32 1, %v427_v11 }
 0x353   :  { %v530_v21 = vrot.slane %v413_v13, %v529_v18 }
 0x359   :  { %v367_v63 = vpop.permute.xlu0 %366 }
 0x35d   :  { %v1565_v2 = vpop.permute.xlu0 %72 }
 0x35e   :  { %vm75_vm10 = vcmp.eq.s32.totalorder %v1565_v2, 1  ;;  %v1031_v2 = vld [vmem:[%s1787_s10 + $0x28] sm:$0xff] }
 0x3a5   :  { %v1229_v42 = vpop.f32.mrf.mxu1 }
 0x3a7   :  { %v355_v50 = vpop.f32.mrf.mxu1 }
 0x411   :  { %v1220_v47 = vpop.f32.mrf.mxu0 }
 0x412   :  { %v361_v48 = vadd.f32 %v1229_v42, %v1220_v47  ;;  %v654_v47 = vld [vmem:[%s1783_s3 + $0x28] sm:$0xff] }
 0x413   :  { %v271_v51 = vpop.f32.mrf.mxu0  ;;  %688 = vmatprep.subr.mxu0 %v654_v47 }
 0x414   :  { %v356_v53 = vadd.f32 %v355_v50, %v271_v51  ;;  %380 = vrot.lane.b32.xlu0 %v361_v48, %s1322_s23  ;;  %v652_v50 = vld [vmem:[%s1783_s3 + $0x18] sm:$0xff]  ;;  %v651_v51 = vld [vmem:[%s1783_s3 + $0x10] sm:$0xff] }
 0x416   :  { %378 = vrot.lane.b32.xlu1 %v356_v53, %s1322_s23  ;;  %v374_v4 = vmul.f32 %v367_v63, %v356_v53  ;;  %v649_v53 = vld [vmem:[%s1783_s3] sm:$0xff] }
 0x418   :  { %423 = vperm.xlu0 %1299, %v399_v55   ;;  %v1323_v55 = vmov 0.0  }
 0x419   :  { %726 = vmatprep.mubr.f32.mxu0 %v1323_v55 }
 0x41a   :  { %418 = vperm.xlu1 %1298, %v398_v57   ;;  %v636_v57 = vld [vmem:[%s1784_s4] sm:$0x3]  ;;  %s1325_s4 = smov 120  }
 0x41b   :  { %v640_v58 = vrot.slane %v636_v57, %v428_v16 }
 0x41c   :  { %1301 = vset.pattern.permute.xlu0 %v1320_v29 }
 0x41d   :  { %524 = vperm.xlu0 %1301, %v412_v61   ;;  %v1170_v61 = vld [vmem:[%s1785_s8] ss:$0 sm:$0xff]  ;;  %s1326_s8 = smov 4  }
 0x41e   :  { %1300 = vset.pattern.permute.xlu1 %v1320_v29  ;;  %v1563_v29 = vpop.permute.xlu1 %69 }
 0x41f   :  { %519 = vperm.xlu1 %1300, %v411_v59   ;;  %vm74_vm9 = vcmp.eq.s32.totalorder %v1563_v29, 1  ;;  %v644_v59 = vrot.slane %v636_v57, %v529_v18 }
 0x421   :  { %1303 = vset.pattern.permute.xlu0 %v1318_v14 }
 0x422   :  { %v372_v3 = vpop.permute.xlu1 %371 }
 0x423   :  { %1302 = vset.pattern.permute.xlu1 %v1318_v14  ;;  %v375_v17 = vmul.f32 %v372_v3, %v361_v48  ;;  %v653_v48 = vld [vmem:[%s1783_s3 + $0x20] sm:$0xff]  ;;  %v645_v3 = vsel %vm74_vm9, %v640_v58, %v644_v59  ;;  %s1324_s3 = smov 32  }
 0x424   :  { %741 = vperm.xlu1 %1302, %v114_v60   ;;  %689 = vmatpush1.msra.mxu0 %v653_v48 }
 0x425   :  { %690 = vmatprep.subr.mxu0 %v652_v50 }
 0x426   :  { %691 = vmatpush1.msra.mxu0 %v651_v51 }
 0x427   :  { %692 = vmatprep.subr.mxu0 %v650_v52 }
 0x428   :  { %746 = vperm.xlu1 %1302, %v115_v62   ;;  %693 = vmatpush1.msra.mxu0 %v649_v53 }
 0x429   :  { %1257 = vmatprep.subr.mxu0 %v1031_v2 }
 0x486   :  { %v381_v9 = vpop.permute.xlu0 %380 }
 0x487   :  { %v1575_v14 = vsel %vm75_vm10, %v375_v17, %v381_v9  ;;  %v646_v17 = vsel %vm75_vm10, %v640_v58, %v644_v59 }
 0x488   :  { %v379_v5 = vpop.permute.xlu1 %378 }
 0x489   :  { %v1571_v12 = vsel %vm74_vm9, %v374_v4, %v379_v5 }
 0x48a   :  { %1234 = vmatprep.mubr.msk.f32.mxu1 %vm432_vm8, %v1571_v12 }
 0x48b   :  { %1235 = vmatmul.mubr.msk.f32.vlgmr.msra.gmra.mxu1 %vm432_vm8, %v1575_v14 }
 0x48c   :  { %1238 = vmatpush3.msra.mxu1 %v546_v20 }
 0x48d   :  { %1239 = vmatprep.subr.mxu1 %v545_v6 }
 0x48e   :  { %1240 = vmatpush3.msra.mxu1 %v545_v6 }
 0x48f   :  { %1241 = vmatprep.subr.mxu1 %v544_v7 }
 0x490   :  { %1242 = vmatpush3.msra.mxu1 %v544_v7 }
 0x491   :  { %1243 = vmatprep.subr.mxu1 %v543_v8 }
 0x492   :  { %1244 = vmatpush3.msra.mxu1 %v543_v8 }
 0x493   :  { %v424_v15 = vpop.permute.xlu0 %423 }
 0x494   :  { %v431_v25 = vmul.f32 %v429_v19, %v424_v15 }
 0x495   :  { %v419_v22 = vpop.permute.xlu1 %418 }
 0x496   :  { %v430_v30 = vmul.f32 %v429_v19, %v419_v22 }
 0x498   :  { %v525_v23 = vpop.permute.xlu0 %524 }
 0x499   :  { %v532_v26 = vmul.f32 %v530_v21, %v525_v23 }
 0x49a   :  { %v520_v27 = vpop.permute.xlu1 %519 }
 0x49b   :  { %v531_v31 = vmul.f32 %v530_v21, %v520_v27  ;;  %v843_v27 = vld [vmem:[%s1786_s9] sm:$0xff] }
 0x49f   :  { %v742_v10 = vpop.permute.xlu1 %741 }
 0x4a3   :  { %v747_v11 = vpop.permute.xlu1 %746 }
 0x54b   :  { %v1236_v28 = vpop.f32.mrf.mxu1 }
 0x54c   :  { %v514_v32 = vadd.f32 %v1236_v28, %v431_v25  ;;  %v1028_v28 = vld [vmem:[%s1787_s10 + $0x10] sm:$0xff] }
 0x54d   :  { %v508_v36 = vpop.f32.mrf.mxu1 }
 0x54e   :  { %v534_v37 = vadd.f32 %v532_v26, %v514_v32  ;;  %v509_v38 = vadd.f32 %v508_v36, %v430_v30  ;;  %v1027_v30 = vld [vmem:[%s1787_s10 + $0x8] sm:$0xff] }
 0x550   :  { %v533_v40 = vadd.f32 %v531_v31, %v509_v38  ;;  %v540_v41 = vadd.f32 %v538_v33, %v534_v37  ;;  %v1026_v31 = vld [vmem:[%s1787_s10] sm:$0xff] }
 0x552   :  { %v539_v42 = vadd.f32 %v538_v33, %v533_v40  ;;  %v542_v46 = vmax.f32 %v540_v41, 0.0 }
 0x554   :  { %v541_v44 = vmax.f32 %v539_v42, 0.0 }
 0x556   :  { %1245 = vmatprep.mubr.msk.f32.mxu1 %vm554_vm11, %v541_v44 }
 0x557   :  { %1246 = vmatmul.mubr.msk.f32.vlgmr.msra.gmra.mxu1 %vm554_vm11, %v542_v46 }
 0x617   :  { %v1247_v60 = vpop.f32.mrf.mxu1 }
 0x618   :  { %v633_v4 = vadd.f32 %v1247_v60, %v1170_v61 }
 0x619   :  { %v627_v62 = vpop.f32.mrf.mxu1 }
 0x61a   :  { %v628_v63 = vadd.f32 %v1170_v61, %v627_v62  ;;  %v1630_v5 = vadd.f32 %v646_v17, %v633_v4 }
 0x61c   :  { %v1624_v9 = vadd.f32 %v645_v3, %v628_v63 }
 0x61e   :  { %1173 = vmatmul.mubr.msk.f32.vlgmr.msra.gmra.mxu0 %vm655_vm12, %v1624_v9 }
 0x61f   :  { %732 = vmatprep.mubr.f32.mxu0 %v1323_v55  ;;  %1258 = vmatpush3.msra.mxu0 %v1031_v2 }
 0x622   :  { %1174 = vmatmul.mubr.msk.f32.gmra.mxu0 %vm655_vm12, %v1630_v5 }
 0x6de   :  { %v728_v20 = vpop.f32.mrf.mxu0 }
 0x6df   :  { %755 = vrot.lane.b32.xlu0 %v728_v20, %s1324_s3  ;;  %v749_v15 = vmul.f32 %v742_v10, %v728_v20 }
 0x6e0   :  { %v730_v6 = vpop.f32.mrf.mxu0 }
 0x6e1   :  { %757 = vrot.lane.b32.xlu1 %v730_v6, %s1324_s3 }
 0x6e2   :  { %v734_v7 = vpop.f32.mrf.mxu0 }
 0x6e3   :  { %759 = vrot.lane.b32.xlu0 %v734_v7, %s1324_s3  ;;  %v750_v22 = vmul.f32 %v747_v11, %v734_v7 }
 0x6e4   :  { %v736_v8 = vpop.f32.mrf.mxu0 }
 0x6e5   :  { %761 = vrot.lane.b32.xlu1 %v736_v8, %s1324_s3 }
 0x6e7   :  { %941 = vrot.lane.b32.xlu0 %v1406_v0, %s1325_s4 }
 0x6e9   :  { %947 = vrot.lane.b32.xlu1 %v1406_v0, %s1326_s8 }
 0x6eb   :  { %974 = vrot.lane.b32.xlu0 %v1406_v0, %s1327_s25 }
 0x6ed   :  { %980 = vrot.lane.b32.xlu1 %v1406_v0, %s1328_s26 }
 0x6ef   :  { %943 = vrot.lane.b32.xlu0 %v1412_v1, %s1325_s4 }
 0x6f1   :  { %949 = vrot.lane.b32.xlu1 %v1412_v1, %s1326_s8 }
 0x6f3   :  { %953 = vrot.lane.b32.xlu0 %v1406_v0, %s1329_s0 }
 0x6f5   :  { %976 = vrot.lane.b32.xlu1 %v1412_v1, %s1327_s25 }
 0x6f7   :  { %982 = vrot.lane.b32.xlu0 %v1412_v1, %s1328_s26 }
 0x6f9   :  { %986 = vrot.lane.b32.xlu1 %v1406_v0, %s1330_s27 }
 0x6fb   :  { %813 = vrot.lane.b32.xlu0 %v1571_v12, %s1331_s28 }
 0x6fd   :  { %955 = vrot.lane.b32.xlu1 %v1412_v1, %s1329_s0 }
 0x6ff   :  { %959 = vrot.lane.b32.xlu0 %v1406_v0, %s1332_s29 }
 0x701   :  { %988 = vrot.lane.b32.xlu1 %v1412_v1, %s1330_s27 }
 0x703   :  { %992 = vrot.lane.b32.xlu0 %v1406_v0, %s1333_s30 }
 0x705   :  { %815 = vrot.lane.b32.xlu1 %v1575_v14, %s1331_s28 }
 0x707   :  { %819 = vrot.lane.b32.xlu0 %v1571_v12, %s1334_s13 }
 0x709   :  { %961 = vrot.lane.b32.xlu1 %v1412_v1, %s1332_s29 }
 0x70b   :  { %994 = vrot.lane.b32.xlu0 %v1412_v1, %s1333_s30  ;;  %v845_v1 = vld [vmem:[%s1786_s9 + $0x10] sm:$0xff] }
 0x70c   :  { %1248 = vmatprep.subr.mxu1 %v845_v1 }
 0x70d   :  { %1249 = vmatpush3.msra.mxu1 %v845_v1 }
 0x751   :  { %v756_v13 = vpop.permute.xlu0 %755 }
 0x753   :  { %v758_v16 = vpop.permute.xlu1 %757 }
 0x754   :  { %v763_v18 = vsel %vm554_vm11, %v756_v13, %v758_v16 }
 0x755   :  { %v767_v0 = vsel %vm74_vm9, %v749_v15, %v763_v18  ;;  %v760_v23 = vpop.permute.xlu0 %759 }
 0x756   :  { %v1658_v19 = vmul.f32 %v767_v0, %v1479_v39  ;;  %v1661_v21 = vmul.f32 %v767_v0, %v1515_v54  ;;  %v844_v39 = vld [vmem:[%s1786_s9 + $0x8] sm:$0xff] }
 0x757   :  { %v762_v24 = vpop.permute.xlu1 %761  ;;  %1250 = vmatprep.subr.mxu1 %v844_v39 }
 0x758   :  { %v764_v25 = vsel %vm554_vm11, %v760_v23, %v762_v24  ;;  %775 = vrot.lane.b32.xlu0 %v1658_v19, %s1335_s14  ;;  %787 = vrot.lane.b32.xlu1 %v1661_v21, %s1335_s14  ;;  %vm808_vm11 = vcmask 785408  }
 0x759   :  { %v768_v54 = vsel %vm75_vm10, %v750_v22, %v764_v25  ;;  %1251 = vmatpush3.msra.mxu1 %v844_v39  ;;  %v942_v32 = vpop.permute.xlu0 %941  ;;  %vm1126_vm10 = vcmask 64544  }
 0x75a   :  { %v1675_v29 = vmul.f32 %v768_v54, %v1488_v43  ;;  %v1678_v26 = vmul.f32 %v768_v54, %v1518_v56  ;;  %1252 = vmatprep.subr.mxu1 %v843_v27  ;;  %v1030_v43 = vld [vmem:[%s1787_s10 + $0x20] sm:$0xff]  ;;  %v1029_v56 = vld [vmem:[%s1787_s10 + $0x18] sm:$0xff]  ;;  %s1337_s10 = smov 48  }
 0x75b   :  { %1253 = vmatpush3.msra.mxu1 %v843_v27  ;;  %1259 = vmatprep.subr.mxu0 %v1030_v43  ;;  %v948_v33 = vpop.permute.xlu1 %947 }
 0x75c   :  { %777 = vrot.lane.b32.xlu0 %v1675_v29, %s1335_s14  ;;  %789 = vrot.lane.b32.xlu1 %v1678_v26, %s1335_s14  ;;  %v965_v59 = vsel %vm432_vm8, %v942_v32, %v948_v33 }
 0x75d   :  { %1260 = vmatpush3.msra.mxu0 %v1030_v43  ;;  %v975_v36 = vpop.permute.xlu0 %974 }
 0x75e   :  { %1261 = vmatprep.subr.mxu0 %v1029_v56 }
 0x75f   :  { %1262 = vmatpush3.msra.mxu0 %v1029_v56  ;;  %v981_v37 = vpop.permute.xlu1 %980 }
 0x760   :  { %825 = vrot.lane.b32.xlu0 %v1571_v12, %s1336_s21  ;;  %821 = vrot.lane.b32.xlu1 %v1575_v14, %s1334_s13  ;;  %v998_v60 = vsel %vm432_vm8, %v975_v36, %v981_v37 }
 0x761   :  { %1263 = vmatprep.subr.mxu0 %v1028_v28  ;;  %v944_v38 = vpop.permute.xlu0 %943 }
 0x762   :  { %1264 = vmatpush3.msra.mxu0 %v1028_v28 }
 0x763   :  { %1265 = vmatprep.subr.mxu0 %v1027_v30  ;;  %v950_v40 = vpop.permute.xlu1 %949 }
 0x764   :  { %827 = vrot.lane.b32.xlu1 %v1575_v14, %s1336_s21  ;;  %1266 = vmatpush3.msra.mxu0 %v1027_v30  ;;  %v966_v61 = vsel %vm432_vm8, %v944_v38, %v950_v40 }
 0x765   :  { %1267 = vmatprep.subr.mxu0 %v1026_v31  ;;  %v954_v41 = vpop.permute.xlu0 %953 }
 0x766   :  { %1268 = vmatpush3.msra.mxu0 %v1026_v31  ;;  %v967_v62 = vsel %vm655_vm12, %v965_v59, %v954_v41 }
 0x767   :  { %v977_v42 = vpop.permute.xlu1 %976 }
 0x769   :  { %v983_v44 = vpop.permute.xlu0 %982 }
 0x76a   :  { %v999_v4 = vsel %vm432_vm8, %v977_v42, %v983_v44 }
 0x76b   :  { %v987_v46 = vpop.permute.xlu1 %986 }
 0x76c   :  { %v1000_v17 = vsel %vm655_vm12, %v998_v60, %v987_v46 }
 0x76d   :  { %v814_v47 = vpop.permute.xlu0 %813 }
 0x76f   :  { %v956_v48 = vpop.permute.xlu1 %955 }
 0x770   :  { %v968_v10 = vsel %vm655_vm12, %v966_v61, %v956_v48 }
 0x771   :  { %v960_v50 = vpop.permute.xlu0 %959 }
 0x772   :  { %v970_v11 = vsel %vm969_vm13, %v967_v62, %v960_v50 }
 0x773   :  { %v989_v51 = vpop.permute.xlu1 %988 }
 0x774   :  { %v1001_v13 = vsel %vm655_vm12, %v999_v4, %v989_v51 }
 0x775   :  { %v993_v52 = vpop.permute.xlu0 %992 }
 0x776   :  { %v1002_v15 = vsel %vm969_vm13, %v1000_v17, %v993_v52 }
 0x777   :  { %v816_v53 = vpop.permute.xlu1 %815 }
 0x779   :  { %v820_v55 = vpop.permute.xlu0 %819 }
 0x77b   :  { %v962_v57 = vpop.permute.xlu1 %961 }
 0x77c   :  { %v971_v39 = vsel %vm969_vm13, %v968_v10, %v962_v57 }
 0x77d   :  { %v995_v58 = vpop.permute.xlu0 %994 }
 0x77e   :  { %v1003_v54 = vsel %vm969_vm13, %v1001_v13, %v995_v58  ;;  %vm1136_vm13 = vcmask 15360  }
 0x7ca   :  { %v776_v63 = vpop.permute.xlu0 %775  ;;  %v788_v3 = vpop.permute.xlu1 %787 }
 0x7cb   :  { %v781_v20 = vsub.f32 %v1661_v21, %v776_v63  ;;  %v793_v6 = vadd.f32 %v788_v3, %v1658_v19 }
 0x7cd   :  { %v1716_v7 = vadd.f32 %v781_v20, %v1467_v35  ;;  %v1719_v8 = vadd.f32 %v793_v6, %v1491_v45  ;;  %v832_v45 = vsel %vm831_vm14, %v1571_v12, %v814_v47 }
 0x7ce   :  { %v778_v16 = vpop.permute.xlu0 %777  ;;  %v790_v18 = vpop.permute.xlu1 %789  ;;  %v834_v25 = vsel %vm432_vm8, %v832_v45, %v820_v55 }
 0x7cf   :  { %v972_v0 = vsub.f32 %v1716_v7, %v970_v11  ;;  %v1004_v19 = vsub.f32 %v1719_v8, %v1002_v15  ;;  %v782_v35 = vsub.f32 %v1678_v26, %v778_v16  ;;  %v794_v21 = vadd.f32 %v790_v18, %v1675_v29 }
 0x7d1   :  { %v1006_v1 = vmul.f32 %v972_v0, %v972_v0  ;;  %v1008_v22 = vmul.f32 %v1004_v19, %v1004_v19  ;;  %v1732_v23 = vadd.f32 %v782_v35, %v1465_v34  ;;  %v1735_v24 = vadd.f32 %v794_v21, %v1502_v49 }
 0x7d2   :  { %v826_v26 = vpop.permute.xlu0 %825  ;;  %v822_v29 = vpop.permute.xlu1 %821  ;;  %v833_v49 = vsel %vm831_vm14, %v1575_v14, %v816_v53  ;;  %vm1139_vm14 = vcmask 23552  }
 0x7d3   :  { %v1010_v27 = vadd.f32 %v1008_v22, %v1006_v1  ;;  %v973_v12 = vsub.f32 %v1732_v23, %v971_v39  ;;  %v1005_v2 = vsub.f32 %v1735_v24, %v1003_v54  ;;  %v837_v43 = vsel %vm836_vm15, %v834_v25, %v826_v26 }
 0x7d4   :  { %v839_v34 = vsub.f32 %v1624_v9, %v837_v43  ;;  %v835_v31 = vsel %vm432_vm8, %v833_v49, %v822_v29 }
 0x7d5   :  { %v1007_v56 = vmul.f32 %v973_v12, %v973_v12  ;;  %v1009_v28 = vmul.f32 %v1005_v2, %v1005_v2  ;;  %1308 = vrsqrt.f32 %v1010_v27  ;;  %vm1014_vm1 = vcmp.eq.f32.partialorder %v1010_v27, inf }
 0x7d6   :  { %v841_v30 = vmul.f32 %v839_v34, %v839_v34  ;;  %v828_v32 = vpop.permute.xlu1 %827  ;;  %v1017_v40 = vand.u32 2147483648, %v1010_v27  ;;  %vm1016_vm2 = vcmp.eq.f32.partialorder %v1010_v27, 0.0 }
 0x7d7   :  { %v1011_v33 = vadd.f32 %v1009_v28, %v1007_v56  ;;  %v838_v36 = vsel %vm836_vm15, %v835_v31, %v828_v32  ;;  %vm1151_vm15 = vcmask 57344  }
 0x7d8   :  { %v840_v37 = vsub.f32 %v1630_v5, %v838_v36  ;;  %1254 = vmatprep.mubr.msk.f32.mxu1 %vm655_vm12, %v841_v30 }
 0x7d9   :  { %1310 = vrsqrt.f32 %v1011_v33  ;;  %vm1021_vm3 = vcmp.eq.f32.partialorder %v1011_v33, inf  ;;  %v1024_v5 = vand.u32 2147483648, %v1011_v33  ;;  %vm1023_vm4 = vcmp.eq.f32.partialorder %v1011_v33, 0.0 }
 0x7da   :  { %v842_v38 = vmul.f32 %v840_v37, %v840_v37 }
 0x7dc   :  { %1255 = vmatmul.mubr.msk.f32.vlgmr.msra.gmra.mxu1 %vm655_vm12, %v842_v38  ;;  %vm1133_vm12 = vcmask 7168  }
 0x7e2   :  { %v1309_v9 = vpop.eup %1308 }
 0x7e3   :  { %v1013_v14 = vmul.f32 %v1309_v9, %v1010_v27 }
 0x7e5   :  { %v1015_v41 = vsel %vm1014_vm1, %v1010_v27, %v1013_v14 }
 0x7e6   :  { %v1311_v42 = vpop.eup %1310  ;;  %v1018_v44 = vsel %vm1016_vm2, %v1017_v40, %v1015_v41 }
 0x7e7   :  { %1269 = vmatprep.mubr.msk.f32.mxu0 %vm805_vm0, %v1018_v44  ;;  %v1020_v46 = vmul.f32 %v1311_v42, %v1011_v33 }
 0x7e9   :  { %v1022_v47 = vsel %vm1021_vm3, %v1011_v33, %v1020_v46 }
 0x7ea   :  { %v1025_v48 = vsel %vm1023_vm4, %v1024_v5, %v1022_v47 }
 0x7eb   :  { %1270 = vmatmul.mubr.msk.f32.vlgmr.msra.gmra.mxu0 %vm805_vm0, %v1025_v48 }
 0x89c   :  { %v1256_v50 = vpop.f32.mrf.mxu1 }
 0x89d   :  { %1312 = vrsqrt.f32 %v1256_v50  ;;  %vm936_vm5 = vcmp.eq.f32.partialorder %v1256_v50, inf  ;;  %v939_v58 = vand.u32 2147483648, %v1256_v50  ;;  %vm938_vm6 = vcmp.eq.f32.partialorder %v1256_v50, 0.0 }
 0x89e   :  { %v918_v51 = vpop.f32.mrf.mxu1 }
 0x89f   :  { %1314 = vrsqrt.f32 %v918_v51  ;;  %vm929_vm8 = vcmp.eq.f32.partialorder %v918_v51, inf  ;;  %v932_v62 = vand.u32 2147483648, %v918_v51  ;;  %vm931_vm9 = vcmp.eq.f32.partialorder %v918_v51, 0.0 }
 0x8aa   :  { %v1313_v52 = vpop.eup %1312 }
 0x8ab   :  { %v935_v53 = vmul.f32 %v1313_v52, %v1256_v50  ;;  %v1271_v57 = vpop.f32.mrf.mxu0 }
 0x8ac   :  { %v1315_v55 = vpop.eup %1314  ;;  %v1123_v10 = vsel %vm1113_vm7, %v1271_v57, inf  ;;  %v1130_v11 = vsel %vm1126_vm10, %v1271_v57, inf }
 0x8ad   :  { %v937_v59 = vsel %vm936_vm5, %v1256_v50, %v935_v53  ;;  %v928_v60 = vmul.f32 %v1315_v55, %v918_v51  ;;  %v1104_v4 = vpop.f32.mrf.mxu0 }
 0x8ae   :  { %v940_v61 = vsel %vm938_vm6, %v939_v58, %v937_v59  ;;  %v1127_v6 = vsel %vm1126_vm10, %v1104_v4, inf  ;;  %v1120_v13 = vsel %vm1113_vm7, %v1104_v4, inf }
 0x8af   :  { %v1117_v63 = vsel %vm1113_vm7, %v940_v61, inf  ;;  %v930_v3 = vsel %vm929_vm8, %v918_v51, %v928_v60 }
 0x8b0   :  { %1118 = vmin.xlane.f32.xlu1 %v1117_v63  ;;  %v933_v17 = vsel %vm931_vm9, %v932_v62, %v930_v3 }
 0x8b1   :  { %v1114_v20 = vsel %vm1113_vm7, %v933_v17, inf }
 0x8b2   :  { %1115 = vmin.xlane.f32.xlu0 %v1114_v20 }
 0x8b4   :  { %1128 = vmin.xlane.f32.xlu1 %v1127_v6 }
 0x8b6   :  { %1124 = vmin.xlane.f32.xlu0 %v1123_v10 }
 0x8ba   :  { %1131 = vmin.xlane.f32.xlu0 %v1130_v11 }
 0x8be   :  { %1121 = vmin.xlane.f32.xlu0 %v1120_v13 }
 0x8c5   :  { %799 = vrot.lane.b32.xlu1 %v1719_v8, %s1337_s10 }
 0x8d4   :  { %801 = vrot.lane.b32.xlu0 %v1735_v24, %s1337_s10 }
 0x939   :  { %v1119_v15 = vpop.xlane.xlu1 %1118 }
 0x93b   :  { %v1116_v16 = vpop.xlane.xlu0 %1115 }
 0x93d   :  { %v1129_v18 = vpop.xlane.xlu1 %1128 }
 0x93f   :  { %v1125_v0 = vpop.xlane.xlu0 %1124 }
 0x940   :  { %v1135_v8 = vsel %vm1133_vm12, %v1119_v15, %v1125_v0 }
 0x941   :  { %v800_v19 = vpop.permute.xlu1 %799 }
 0x942   :  { %v806_v35 = vsel %vm805_vm0, %v1716_v7, %v800_v19 }
 0x943   :  { %v809_v21 = vsel %vm808_vm11, %v806_v35, 0.0  ;;  %v1132_v45 = vpop.xlane.xlu0 %1131 }
 0x944   :  { %811 = vst [vmem:[%s1788_s11] sm:$0xff] %v809_v21  ;;  %v1138_v1 = vsel %vm1136_vm13, %v1135_v8, %v1132_v45 }
 0x945   :  { %v1141_v39 = vsel %vm1139_vm14, %v1138_v1, 0.0 }
 0x947   :  { %v1122_v22 = vpop.xlane.xlu0 %1121 }
 0x948   :  { %v1134_v24 = vsel %vm1133_vm12, %v1116_v16, %v1122_v22 }
 0x949   :  { %v1137_v25 = vsel %vm1136_vm13, %v1134_v24, %v1129_v18 }
 0x94a   :  { %v1140_v54 = vsel %vm1139_vm14, %v1137_v25, 0.0 }
 0x94b   :  { %v1142_v7 = vadd.f32 %v1141_v39, %v1140_v54  ;;  %v802_v26 = vpop.permute.xlu0 %801 }
 0x94c   :  { %v807_v29 = vsel %vm805_vm0, %v1732_v23, %v802_v26 }
 0x94d   :  { %v1143_v27 = vrot.slane %v1142_v7, 4  ;;  %v810_v12 = vsel %vm808_vm11, %v807_v29, 0.0 }
 0x94e   :  { %812 = vst [vmem:[%s1788_s11 + $0x8] sm:$0xff] %v810_v12 }
 0x94f   :  { %v1144_v2 = vadd.f32 %v1143_v27, %v1142_v7 }
 0x951   :  { %v1145_v43 = vrot.slane %v1144_v2, 2 }
 0x953   :  { %v1146_v34 = vadd.f32 %v1145_v43, %v1144_v2 }
 0x955   :  { %v1147_v49 = vrot.slane %v1146_v34, 1 }
 0x957   :  { %v1148_v56 = vadd.f32 %v1147_v49, %v1146_v34 }
 0x959   :  { %v1149_v28 = vmul.f32 0.0625, %v1148_v56 }
 0x95b   :  { %v1150_v30 = vsel %vm1139_vm14, %v1149_v28, 0.0 }
 0x95c   :  { %1152 = vst.msk [vmem:[%s1789_s12] sm:$0x1] %vm1151_vm15, %v1150_v30 }

</bundles_post_ra>
